<compile_context>
chip_gen: v7x
topology: tpu7x:2x2x1
jax: 0.10.0
libtpu: 0.0.40
codegen_flags: <defaults>
</compile_context>

<pallas_src>
import jax
import jax.numpy as jnp
from jax.experimental import pallas as pl
from jax.experimental.pallas import tpu as pltpu

_LANES = 128
_ROW_ALIGN = 32                 # sublane alignment covering f32 (8) / bf16 (16) / int8 (32)


def _round_up(v, m):
    return ((v + m - 1) // m) * m


def _inv_model_kernel(x_ref, m_ref, s_ref, o_ref):
    """x_ref: (TM, 128) interleaved [G elements x D features per row];
    m_ref: (128, 128) block-diagonal replication of B;
    s_ref: (128, G) group-sum matrix; o_ref: (TM, G)."""
    xf = x_ref[...].astype(jnp.float32)
    # z[r, D*t+i] = sum_j x[r, D*t+j] * B[j, i]  (block-diag keeps elements independent)
    z = jnp.dot(xf, m_ref[...], preferred_element_type=jnp.float32)
    p = z * xf                                    # p[r, D*t+i] = x_i * (x^T B)_i
    # y[r, t] = sum_i p[r, D*t+i] = x^T B x for element (r, t)
    y = jnp.dot(p, s_ref[...], preferred_element_type=jnp.float32)
    o_ref[...] = y.astype(o_ref.dtype)


def inv_model_forward(x, bi_tensor, *, tile_rows=1024):
    """y[...] = sum_ij x[..., i] * B[i, j] * x[..., j] for any batch shape."""
    d = x.shape[-1]
    batch_shape = x.shape[:-1]
    n = 1
    for s in batch_shape:
        n *= s
    out_dtype = jnp.promote_types(x.dtype, bi_tensor.dtype)

    if n == 0:
        return jnp.zeros(batch_shape, out_dtype)
    if _LANES % d != 0:
        # Interleaved layout needs D | 128 (true for dinput=4). Rare fallback: XLA einsum.
        xp = x.astype(out_dtype)
        return jnp.einsum("...i,ij,...j->...", xp, bi_tensor.astype(out_dtype), xp)

    g = _LANES // d                               # batch elements per 128-lane row (32 for D=4)

    # --- tiling: N lives on (sublane, lane) of the interleaved slab -----------------
    r0 = -(-n // g)                               # interleave rows needed
    tm = min(_round_up(max(tile_rows, _ROW_ALIGN), _ROW_ALIGN),
             _round_up(r0, _ROW_ALIGN))           # rows per grid step
    r_total = _round_up(r0, tm)
    n_pad = r_total * g
    grid = (r_total // tm,)

    x2d = x.reshape(n, d)
    if n_pad != n:
        x2d = jnp.pad(x2d, ((0, n_pad - n), (0, 0)))   # zero rows -> zero (discarded) output
    x_il = x2d.reshape(r_total, _LANES)                 # free row-major reshape, no transpose

    # Constant matrices (built once per call; stay VMEM-resident across grid steps).
    bf = bi_tensor.astype(jnp.float32)
    eye_g = jnp.eye(g, dtype=jnp.float32)
    m_blockdiag = jnp.kron(eye_g, bf)                                # (128, 128)
    s_groupsum = jnp.kron(eye_g, jnp.ones((d, 1), jnp.float32))      # (128, g)

    out = pl.pallas_call(
        _inv_model_kernel,
        out_shape=jax.ShapeDtypeStruct((r_total, g), out_dtype),
        grid=grid,
        in_specs=[
            pl.BlockSpec((tm, _LANES), lambda i: (i, 0)),
            pl.BlockSpec((_LANES, _LANES), lambda i: (0, 0)),
            pl.BlockSpec((_LANES, g), lambda i: (0, 0)),
        ],
        out_specs=pl.BlockSpec((tm, g), lambda i: (i, 0)),
        compiler_params=pltpu.CompilerParams(
            dimension_semantics=("parallel",),
        ),
    )(x_il, m_blockdiag, s_groupsum)

    # Element k of the flat batch is out[k // g, k % g]; reshape is contiguous.
    return out.reshape(n_pad)[:n].reshape(batch_shape)


def make_bi_tensor(dinput=4, init="rand", key=None):
    """Deterministic parameter init matching inv_model.__init__ semantics."""
    if init == "eta":
        diag = jnp.full((dinput,), -1.0, jnp.float32).at[0].set(1.0)
        bi = jnp.diag(diag)
    elif init == "delta":
        bi = jnp.eye(dinput, dtype=jnp.float32)
    else:
        if key is None:
            key = jax.random.PRNGKey(42)
        bi = jax.random.normal(key, (dinput, dinput), jnp.float32)
    bi = (bi + bi.T) * 0.5
    return bi


if __name__ == "__main__":
    dinput = 4

    key = jax.random.PRNGKey(0)
    kx1, kx2, kb = jax.random.split(key, 3)
    bi_tensor = make_bi_tensor(dinput, init="rand", key=kb)

    # Small shape consistent with the module: x (batch, seq, dinput) -> y (batch, seq).
    x1 = jax.random.normal(kx1, (2, 8, dinput), jnp.float32)
    y1 = jax.block_until_ready(inv_model_forward(x1, bi_tensor))
    y1_ref = jnp.einsum("...i,ij,...j->...", x1, bi_tensor, x1)
    assert y1.shape == x1.shape[:-1]
    assert jnp.allclose(y1, y1_ref, atol=1e-5, rtol=1e-5)

    # Multi-grid-step path + ragged padding + bf16 input (cast to f32 in-kernel).
    x2 = jax.random.normal(kx2, (2, 2100, dinput), jnp.float32).astype(jnp.bfloat16)
    y2 = jax.block_until_ready(inv_model_forward(x2, bi_tensor, tile_rows=64))
    x2f = x2.astype(jnp.float32)
    y2_ref = jnp.einsum("...i,ij,...j->...", x2f, bi_tensor, x2f)
    assert y2.shape == x2.shape[:-1]
    assert jnp.allclose(y2, y2_ref, atol=1e-4, rtol=1e-4)

    print("KERNEL_OK")
</pallas_src>

<mosaic_0001>
module attributes {stable_mosaic.version = 11 : i64} {
  func.func @_inv_model_kernel(%arg0: i32, %arg1: memref<32x128xf32, #tpu.memory_space<vmem>>, %arg2: memref<128x128xf32, #tpu.memory_space<vmem>>, %arg3: memref<128x32xf32, #tpu.memory_space<vmem>>, %arg4: memref<32x32xf32, #tpu.memory_space<vmem>>) attributes {dimension_semantics = [#tpu.dimension_semantics<parallel>], iteration_bounds = array<i64: 1>, scalar_prefetch = 0 : i64, scratch_operands = 0 : i64, tpu.core_type = #tpu.core_type<tc>, window_params = [{transform_indices = @transform_0, window_bounds = array<i64: 32, 128>}, {pipeline_mode = #tpu.pipeline_mode<synchronous>, transform_indices = @transform_1, window_bounds = array<i64: 128, 128>}, {pipeline_mode = #tpu.pipeline_mode<synchronous>, transform_indices = @transform_2, window_bounds = array<i64: 128, 32>}, {transform_indices = @transform_3, window_bounds = array<i64: 32, 32>}]} {
    %c0 = arith.constant 0 : index
    %c0_0 = arith.constant 0 : index
    %0 = vector.load %arg1[%c0, %c0_0] : memref<32x128xf32, #tpu.memory_space<vmem>>, vector<32x128xf32>
    %c0_1 = arith.constant 0 : index
    %c0_2 = arith.constant 0 : index
    %1 = vector.load %arg2[%c0_1, %c0_2] : memref<128x128xf32, #tpu.memory_space<vmem>>, vector<128x128xf32>
    %cst = arith.constant dense<0.000000e+00> : vector<32x128xf32>
    %2 = tpu.matmul %0, %1, %cst {dimension_numbers = #tpu.dot_dimension_numbers<[1], [0], [0], [1], [0, 0, 1, 1], [], []>} : vector<32x128xf32>, vector<128x128xf32>, vector<32x128xf32> -> vector<32x128xf32>
    %3 = arith.mulf %2, %0 : vector<32x128xf32>
    %c0_3 = arith.constant 0 : index
    %c0_4 = arith.constant 0 : index
    %4 = vector.load %arg3[%c0_3, %c0_4] : memref<128x32xf32, #tpu.memory_space<vmem>>, vector<128x32xf32>
    %cst_5 = arith.constant dense<0.000000e+00> : vector<32x32xf32>
    %5 = tpu.matmul %3, %4, %cst_5 {dimension_numbers = #tpu.dot_dimension_numbers<[1], [0], [0], [1], [0, 0, 1, 1], [], []>} : vector<32x128xf32>, vector<128x32xf32>, vector<32x32xf32> -> vector<32x32xf32>
    %c0_6 = arith.constant 0 : index
    %c0_7 = arith.constant 0 : index
    %6 = vector.load %arg4[%c0_6, %c0_7] : memref<32x32xf32, #tpu.memory_space<vmem>>, vector<32x32xf32>
    tpu.vector_store %arg4[%c0_6, %c0_7], %5 {strides = array<i32>} : memref<32x32xf32, #tpu.memory_space<vmem>>, vector<32x32xf32>,
    return
  }
  func.func @transform_0(%arg0: i32) -> (i32, i32) {
    %c0_i32 = arith.constant 0 : i32
    %c0_i32_0 = arith.constant 0 : i32
    return %arg0, %c0_i32 : i32, i32
  }
  func.func @transform_1(%arg0: i32) -> (i32, i32) {
    %c0_i32 = arith.constant 0 : i32
    %c0_i32_0 = arith.constant 0 : i32
    %c0_i32_1 = arith.constant 0 : i32
    return %c0_i32, %c0_i32_0 : i32, i32
  }
  func.func @transform_2(%arg0: i32) -> (i32, i32) {
    %c0_i32 = arith.constant 0 : i32
    %c0_i32_0 = arith.constant 0 : i32
    %c0_i32_1 = arith.constant 0 : i32
    return %c0_i32, %c0_i32_0 : i32, i32
  }
  func.func @transform_3(%arg0: i32) -> (i32, i32) {
    %c0_i32 = arith.constant 0 : i32
    %c0_i32_0 = arith.constant 0 : i32
    return %arg0, %c0_i32 : i32, i32
  }
}

</mosaic_0001>

<bundles_post_ra>
// kernel: tpu_custom_call.1
= control target key start
LH: loop header
LB: loop body
LE: loop exit
PB: predicated region body
PF: predicated region fallthrough
CT: control target
= control target key end

     0   :  { %s600_s0 = inlined_call_operand.vmem [shape: f32[32,128], index: 0, kind: input, shape index: {}]   ;;  %s601_s1 = inlined_call_operand.vmem [shape: f32[128,128], index: 1, kind: input, shape index: {}]   ;;  %s602_s2 = inlined_call_operand.vmem [shape: f32[128,32], index: 2, kind: input, shape index: {}]   ;;  %s603_s3 = inlined_call_operand.hbm [shape: f32[32,32], index: 3, kind: output, shape index: {}]  }
   0x1   :  { %v19_v0 = vld [vmem:[%s601_s1] sm:$0xff]  ;;  %v20_v1 = vld [vmem:[%s601_s1 + $0x8] sm:$0xff]  ;;  %v21_v2 = vld [vmem:[%s601_s1 + $0x10] sm:$0xff] }
   0x2   :  { %v362_v3 = vpack.c.bf16 %v20_v1, %v19_v0  ;;  %v22_v4 = vld [vmem:[%s601_s1 + $0x18] sm:$0xff]  ;;  %v23_v6 = vld [vmem:[%s601_s1 + $0x20] sm:$0xff]  ;;  %v24_v7 = vld [vmem:[%s601_s1 + $0x28] sm:$0xff] }
   0x3   :  { %v366_v5 = vpack.c.bf16 %v22_v4, %v21_v2  ;;  %v370_v8 = vpack.c.bf16 %v24_v7, %v23_v6  ;;  %v497_v9 = vld [vmem:[%s600_s0] sm:$0xff]  ;;  %v25_v10 = vld [vmem:[%s601_s1 + $0x30] sm:$0xff]  ;;  %v26_v11 = vld [vmem:[%s601_s1 + $0x38] sm:$0xff] }
   0x4   :  { %363 = vmatprep.subr.bf16.mxu0 %v362_v3  ;;  %318 = vmatprep.mubr.f32.mxu0 %v497_v9  ;;  %v124_v12 = vld [vmem:[%s602_s2] sm:$0xff]  ;;  %v125_v13 = vld [vmem:[%s602_s2 + $0x8] sm:$0xff]  ;;  %v126_v14 = vld [vmem:[%s602_s2 + $0x10] sm:$0xff]  ;;  %v374_v18 = vpack.c.bf16 %v26_v11, %v25_v10 }
   0x5   :  { %365 = vmatpush3.bf16.msra.mxu0 %v362_v3  ;;  %v127_v15 = vld [vmem:[%s602_s2 + $0x18] sm:$0xff]  ;;  %v394_v16 = vpack.c.bf16 %v125_v13, %v124_v12  ;;  %v128_v19 = vld [vmem:[%s602_s2 + $0x20] sm:$0xff]  ;;  %v129_v20 = vld [vmem:[%s602_s2 + $0x28] sm:$0xff] }
   0x6   :  { %367 = vmatprep.subr.bf16.mxu0 %v366_v5  ;;  %v398_v17 = vpack.c.bf16 %v127_v15, %v126_v14  ;;  %v27_v21 = vld [vmem:[%s601_s1 + $0x40] sm:$0xff]  ;;  %v28_v22 = vld [vmem:[%s601_s1 + $0x48] sm:$0xff] }
   0x7   :  { %395 = vmatprep.subr.bf16.mxu1 %v394_v16 }
   0x8   :  { %397 = vmatpush3.bf16.msra.mxu1 %v394_v16 }
   0x9   :  { %369 = vmatpush3.bf16.msra.mxu0 %v366_v5 }
   0xa   :  { %371 = vmatprep.subr.bf16.mxu0 %v370_v8 }
   0xb   :  { %8 = vsyncpa [#allocation3], 0  ;;  %399 = vmatprep.subr.bf16.mxu1 %v398_v17  ;;  %v402_v23 = vpack.c.bf16 %v129_v20, %v128_v19  ;;  %v378_v24 = vpack.c.bf16 %v28_v22, %v27_v21  ;;  %v130_v25 = vld [vmem:[%s602_s2 + $0x30] sm:$0xff]  ;;  %v131_v26 = vld [vmem:[%s602_s2 + $0x38] sm:$0xff]  ;;  %vm225_vm0 = vcmask 261120  }
   0xc   :  { %v29_v27 = vld [vmem:[%s601_s1 + $0x50] sm:$0xff]  ;;  %v30_v28 = vld [vmem:[%s601_s1 + $0x58] sm:$0xff]  ;;  %401 = vmatpush3.bf16.msra.mxu1 %v398_v17  ;;  %v406_v29 = vpack.c.bf16 %v131_v26, %v130_v25  ;;  %v132_v31 = vld [vmem:[%s602_s2 + $0x40] sm:$0xff] }
   0xd   :  { %373 = vmatpush3.bf16.msra.mxu0 %v370_v8  ;;  %403 = vmatprep.subr.bf16.mxu1 %v402_v23  ;;  %v382_v30 = vpack.c.bf16 %v30_v28, %v29_v27  ;;  %v133_v32 = vld [vmem:[%s602_s2 + $0x48] sm:$0xff]  ;;  %v31_v33 = vld [vmem:[%s601_s1 + $0x60] sm:$0xff]  ;;  %v134_v37 = vld [vmem:[%s602_s2 + $0x50] sm:$0xff] }
   0xe   :  { %375 = vmatprep.subr.bf16.mxu0 %v374_v18  ;;  %v32_v34 = vld [vmem:[%s601_s1 + $0x68] sm:$0xff]  ;;  %v410_v35 = vpack.c.bf16 %v133_v32, %v132_v31  ;;  %v135_v38 = vld [vmem:[%s602_s2 + $0x58] sm:$0xff]  ;;  %v33_v39 = vld [vmem:[%s601_s1 + $0x70] sm:$0xff] }
   0xf   :  { %v386_v36 = vpack.c.bf16 %v32_v34, %v31_v33  ;;  %v34_v40 = vld [vmem:[%s601_s1 + $0x78] sm:$0xff]  ;;  %v414_v41 = vpack.c.bf16 %v135_v38, %v134_v37  ;;  %v136_v43 = vld [vmem:[%s602_s2 + $0x60] sm:$0xff]  ;;  %v137_v44 = vld [vmem:[%s602_s2 + $0x68] sm:$0xff] }
  0x10   :  { %405 = vmatpush3.bf16.msra.mxu1 %v402_v23  ;;  %v390_v42 = vpack.c.bf16 %v34_v40, %v33_v39  ;;  %v418_v45 = vpack.c.bf16 %v137_v44, %v136_v43  ;;  %v16_v46 = vld [vmem:[%s600_s0 + $0x8] sm:$0xff]  ;;  %v17_v47 = vld [vmem:[%s600_s0 + $0x10] sm:$0xff]  ;;  %v18_v48 = vld [vmem:[%s600_s0 + $0x18] sm:$0xff]  ;;  %s453_s0 = smov [#allocation2]  }
  0x11   :  { %377 = vmatpush3.bf16.msra.mxu0 %v374_v18  ;;  %407 = vmatprep.subr.bf16.mxu1 %v406_v29  ;;  %v138_v49 = vld [vmem:[%s602_s2 + $0x70] sm:$0xff]  ;;  %v139_v50 = vld [vmem:[%s602_s2 + $0x78] sm:$0xff]  ;;  %s235_s2 = sshll.u32 %s453_s0, 4  ;;  %s236_s2 = int_to_ptr.vmem [resolvable:$true] %s235_s2 }
  0x12   :  { %379 = vmatprep.subr.bf16.mxu0 %v378_v24  ;;  %v422_v51 = vpack.c.bf16 %v139_v50, %v138_v49  ;;  %s429_s29 = scalar_lea.vmem %s236_s2, 512  ;;  %p434_p1 = scmp.lt.s32.totalorder %s236_s2, %s236_s2 }
  0x13   :  { %p430_p0 = scmp.ne.s32.totalorder %s236_s2, %s429_s29  ;;  %p435_p2 = scmp.lt.s32.totalorder %s429_s29, %s429_s29 }
  0x14   :  { %409 = vmatpush3.bf16.msra.mxu1 %v406_v29 }
  0x15   :  { %381 = vmatpush3.bf16.msra.mxu0 %v378_v24  ;;  %411 = vmatprep.subr.bf16.mxu1 %v410_v35  ;;  %p436_p3 = por %p435_p2, %p434_p1 }
  0x16   :  { %383 = vmatprep.subr.bf16.mxu0 %v382_v30 }
  0x17   :  { %p437_p4 = pnand %p436_p3, %p430_p0 }
  0x18   :  { %413 = vmatpush3.bf16.msra.mxu1 %v410_v35 }
  0x19   :  { %385 = vmatpush3.bf16.msra.mxu0 %v382_v30  ;;  %415 = vmatprep.subr.bf16.mxu1 %v414_v41 }
  0x1a   :  { %387 = vmatprep.subr.bf16.mxu0 %v386_v36 }
  0x1c   :  { %417 = vmatpush3.bf16.msra.mxu1 %v414_v41 }
  0x1d   :  { %389 = vmatpush3.bf16.msra.mxu0 %v386_v36  ;;  %419 = vmatprep.subr.bf16.mxu1 %v418_v45 }
  0x1e   :  { %391 = vmatprep.subr.bf16.mxu0 %v390_v42 }
  0x20   :  { %421 = vmatpush3.bf16.msra.mxu1 %v418_v45 }
  0x21   :  { %393 = vmatpush3.bf16.msra.mxu0 %v390_v42  ;;  %423 = vmatprep.subr.bf16.mxu1 %v422_v51 }
  0x24   :  { %319 = vmatmul.mubr.f32.vlgmr.msra.gmra.mrb[0].mxu0 %v16_v46  ;;  %425 = vmatpush3.bf16.msra.mxu1 %v422_v51 }
  0x25   :  { %321 = vmatprep.mubr.f32.mxu0 %v17_v47 }
  0x28   :  { %322 = vmatmul.mubr.f32.gmra.mrb[2].mxu0 %v18_v48 }
  0xf7   :  { %v320_v52 = vpop.f32.mrb[0].mxu0 }
  0xf8   :  { %v101_v53 = vpop.f32.mrb[1].mxu0  ;;  %v121_v55 = vmul.f32 %v320_v52, %v16_v46 }
  0xf9   :  { %v120_v54 = vmul.f32 %v101_v53, %v497_v9 }
  0xfb   :  { %v323_v56 = vpop.f32.mrb[2].mxu0  ;;  %356 = vmatprep.mubr.f32.mxu1 %v120_v54 }
  0xfc   :  { %v111_v57 = vpop.f32.mrb[3].mxu0  ;;  %357 = vmatmul.mubr.f32.vlgmr.msra.gmra.mrb[0].mxu1 %v121_v55  ;;  %v123_v59 = vmul.f32 %v323_v56, %v18_v48 }
  0xfd   :  { %v122_v58 = vmul.f32 %v111_v57, %v17_v47 }
  0xff   :  { %359 = vmatprep.mubr.f32.mxu1 %v122_v58 }
 0x100   :  { %360 = vmatmul.mubr.f32.gmra.mrb[2].mxu1 %v123_v59 }
 0x1cf   :  { %v358_v60 = vpop.f32.mrb[0].mxu1 }
 0x1d0   :  { %227 = vst.msk [vmem:[#allocation2 + $0x8] sm:$0xff] %vm225_vm0, %v358_v60  ;;  %v206_v61 = vpop.f32.mrb[1].mxu1 }
 0x1d1   :  { %226 = vst.msk [vmem:[#allocation2] sm:$0xff] %vm225_vm0, %v206_v61 }
 0x1d3   :  { %v361_v62 = vpop.f32.mrb[2].mxu1 }
 0x1d4   :  { %229 = vst.msk [vmem:[#allocation2 + $0x18] sm:$0xff] %vm225_vm0, %v361_v62  ;;  %v216_v63 = vpop.f32.mrb[3].mxu1 }
 0x1d5   :  { %228 = vst.msk [vmem:[#allocation2 + $0x10] sm:$0xff] %vm225_vm0, %v216_v63 }
 0x1d6   :  { %440 = shalt.err (!%p437_p4)
}
 0x1d7   :  { %s441_s5 = scalar_lea.hbm %s603_s3, 512 }
 0x1d8   :  { %p442_p5 = scmp.ne.s32.totalorder %s603_s3, %s441_s5  ;;  %p445_p6 = scmp.lt.u32.totalorder %s441_s5, %s603_s3 }
 0x1da   :  { %p447_p7 = pnand %p445_p6, %p442_p5 }
 0x1dc   :  { %450 = shalt.err (!%p447_p7)
}
 0x1dd   :  { %s454_s10 = smov 128   ;;  %s455_s11 = smov 8  }
 0x1de   :  { %241 = dma.vmem_to_hbm [thread:$0]  %s236_s2, 512, %s603_s3, [#allocation3], %s454_s10, %s454_s10, %s455_s11  }
 0x1df   :  { %451 = dma.done.wait [#allocation3], 512  }
 0x1e0   :  { %452 = vsyncadd [#allocation3], 4294966784 }
 0x1e1   :  { %245 = vsyncpa [#allocation3], 1 }

</bundles_post_ra>
